<compile_context>
chip_gen: v7x
topology: tpu7x:2x2x1
jax: 0.10.0
libtpu: 0.0.40
codegen_flags: <defaults>
</compile_context>

<pallas_src>
import functools

import numpy as np

import jax
import jax.numpy as jnp
from jax import lax
from jax.experimental import pallas as pl
from jax.experimental.pallas import tpu as pltpu

INPUT_MESH_FEATS = 3          # cfg.GCC.INPUT_MESH_FEATS
HIDDEN_DIMS = [16, 32]        # cfg.GCC.HIDDEN_DIMS
NEURDIMS2 = 256               # hard-coded in the module
BN_EPS = 1e-5                 # nn.BatchNorm1d default eps
HEAD_OUT_DIMS = (3, 4, 5)     # style / functionality / aesthetics
SMALL_K_VPU = 8               # contraction depths <= this skip the MXU


def _gcc_kernel(num_layers, panels,
                verts_ref, deg_ref, pool_ref, adj_hbm, *rest):
    """rest = [(wcat_l, vecs_l) * num_layers, wa, ba, wb, bb,
               out, adj_buf, adj_sem, nbr_ref]

    wcat_l : (din, 2*dout)   -> [w0 | w1]  (f32 if VPU path else bf16)
    vecs_l : (4, dout)  f32  -> rows = b0, b1, gamma, beta
    wa     : (neurdims, 768) bf16  (concat of 3 head first-layer weights)
    ba     : (1, 768)   f32
    wb     : (768, 12)  bf16  (block-diagonal head second-layer weights)
    bb     : (1, 12)    f32
    out    : (M, 12)    f32  -> [style(3) | functionality(4) | aesthetics(5)]
    """
    layer_refs = rest[:2 * num_layers]
    (wa_ref, ba_ref, wb_ref, bb_ref, out_ref,
     adj_buf, adj_sem, nbr_ref) = rest[2 * num_layers:]

    n_panels = len(panels)
    tile_r = adj_buf.shape[1]
    V = adj_hbm.shape[0]

    def start_panel(p, slot):
        r0, rows = panels[p]
        src = adj_hbm if (r0 == 0 and rows == V) else adj_hbm.at[pl.ds(r0, rows), :]
        dst = (adj_buf.at[slot] if rows == tile_r
               else adj_buf.at[slot, pl.ds(0, rows), :])
        d = pltpu.make_async_copy(src, dst, adj_sem.at[slot])
        d.start()
        return d

    h = verts_ref[...]        # (V, din0) f32
    deg = deg_ref[...]        # (V, 1)    f32

    # GraphConv -> BatchNorm1d -> ReLU stack.
    for li in range(num_layers):
        wcat = layer_refs[2 * li][...]        # (din, 2*dout)
        vecs = layer_refs[2 * li + 1][...]    # (4, dout) f32
        din, dout2 = wcat.shape
        dout = dout2 // 2

        # Prefetch the first adjacency panel; its HBM->VMEM DMA overlaps the
        # h @ [w0|w1] matmul below.
        descs = [None] * n_panels
        descs[0] = start_panel(0, 0)

        if din <= SMALL_K_VPU:
            # Tiny contraction depth: VPU broadcast multiply-adds beat an MXU
            # round-trip (din=3 is <3% MXU occupancy).  Kept in f32 on the VPU.
            hw = h[:, 0:1] * wcat[0:1, :]
            for k in range(1, din):
                hw = hw + h[:, k:k + 1] * wcat[k:k + 1, :]
        else:
            # One fused, wider bf16 matmul with f32 accumulation.
            hw = jnp.dot(h.astype(jnp.bfloat16), wcat,
                         preferred_element_type=jnp.float32)

        hw0 = hw[:, :dout]                           # h @ w0  (f32)
        hw1_bf = hw[:, dout:].astype(jnp.bfloat16)   # h @ w1  (bf16 MXU operand)

        # adj @ (h @ w1): stream adjacency row panels from HBM, double-buffered.
        for p in range(n_panels):
            slot = p & 1
            if p + 1 < n_panels:
                descs[p + 1] = start_panel(p + 1, 1 - slot)
            descs[p].wait()
            r0, rows = panels[p]
            adj_panel = adj_buf[slot][:rows, :]      # (rows, V) bf16
            nbr_ref[r0:r0 + rows, 0:dout] = jnp.dot(
                adj_panel, hw1_bf, preferred_element_type=jnp.float32)

        nbr = nbr_ref[:, 0:dout]

        b0 = vecs[0:1, :]
        b1 = vecs[1:2, :]
        gamma = vecs[2:3, :]
        beta = vecs[3:4, :]

        # b1 folded through the aggregation:
        # adj @ (h@w1 + b1) == adj @ (h@w1) + deg * b1.
        x = hw0 + b0 + nbr + deg * b1

        # BatchNorm1d (training mode): batch stats over the vertex axis, biased
        # variance; affine folded into one scale.
        mu = jnp.mean(x, axis=0, keepdims=True)
        var = jnp.mean((x - mu) * (x - mu), axis=0, keepdims=True)
        s = gamma * lax.rsqrt(var + BN_EPS)
        h = jnp.maximum((x - mu) * s + beta, 0.0)

    # Per-mesh mean pooling (packed_to_list + mean + cat) as one matmul.
    pooled = jnp.dot(pool_ref[...], h.astype(jnp.bfloat16),
                     preferred_element_type=jnp.float32)          # (M, neurdims)

    # Fused heads: one (M, 768) hidden layer, one block-diagonal (768, 12) out.
    a = jnp.maximum(
        jnp.dot(pooled.astype(jnp.bfloat16), wa_ref[...],
                preferred_element_type=jnp.float32) + ba_ref[...], 0.0)
    out_ref[...] = (
        jnp.dot(a.astype(jnp.bfloat16), wb_ref[...],
                preferred_element_type=jnp.float32) + bb_ref[...])


def pack_params(params):
    """Pack per-layer / per-head parameter lists into a few dense arrays,
    casting MXU operands to bf16 (VPU-path layer weights stay f32)."""
    packed_layers = []
    for (w0, b0, w1, b1, gamma, beta) in params["layers"]:
        wcat = jnp.concatenate([w0, w1], axis=1)                       # (din, 2*dout)
        din = wcat.shape[0]
        wcat = wcat.astype(jnp.float32 if din <= SMALL_K_VPU else jnp.bfloat16)
        vecs = jnp.concatenate([b0, b1, gamma, beta], axis=0)          # (4, dout)
        packed_layers.append((wcat, vecs.astype(jnp.float32)))

    wa_cat = jnp.concatenate([hp[0] for hp in params["heads"]],
                             axis=1).astype(jnp.bfloat16)              # (32, 768)
    ba_cat = jnp.concatenate([hp[1] for hp in params["heads"]],
                             axis=1).astype(jnp.float32)               # (1, 768)
    total_out = sum(HEAD_OUT_DIMS)
    wb_blk = jnp.zeros((NEURDIMS2 * len(HEAD_OUT_DIMS), total_out), jnp.float32)
    col = 0
    for hidx, (_, _, wb, _) in enumerate(params["heads"]):
        od = HEAD_OUT_DIMS[hidx]
        wb_blk = wb_blk.at[hidx * NEURDIMS2:(hidx + 1) * NEURDIMS2,
                           col:col + od].set(wb)
        col += od
    wb_blk = wb_blk.astype(jnp.bfloat16)                               # (768, 12)
    bb_cat = jnp.concatenate([hp[3] for hp in params["heads"]],
                             axis=1).astype(jnp.float32)               # (1, 12)
    return packed_layers, (wa_cat, ba_cat, wb_blk, bb_cat)


def _tpu_vmem_bytes():
    try:
        return int(pltpu.get_tpu_info().vmem_capacity_bytes)
    except Exception:
        return 64 * 1024 * 1024   # conservative fallback: v7x per-TC VMEM


def gcc_forward(verts, adj, pool, params):
    num_layers = len(params["layers"])
    V = adj.shape[0]
    M = pool.shape[0]
    total_out = sum(HEAD_OUT_DIMS)

    # deg precomputed in the wrapper (review item): removes the in-kernel
    # reduction over the full adjacency and decouples it from adj residency.
    deg = jnp.sum(adj.astype(jnp.float32), axis=1, keepdims=True)       # (V, 1)

    # bf16 MXU operands; f32 accumulation happens in-kernel.
    adj_bf = adj.astype(jnp.bfloat16)     # small-integer counts: exact in bf16
    pool_bf = pool.astype(jnp.bfloat16)
    verts_f32 = verts.astype(jnp.float32)

    packed_layers, head_pack = pack_params(params)
    dmax = max(vecs.shape[1] for _, vecs in packed_layers)

    # Generation-aware adjacency row-panel size (double buffer of bf16 panels).
    vmem_phys = _tpu_vmem_bytes()
    dbuf_budget = (8 if vmem_phys <= 64 * 1024 * 1024 else 24) * 1024 * 1024
    tile_r = min(V, max(8, dbuf_budget // max(1, 4 * V)))
    if tile_r < V:
        tile_r = max(8, (tile_r // 8) * 8)
    panels = tuple((r0, min(tile_r, V - r0)) for r0 in range(0, V, tile_r))

    flat = [verts_f32, deg, pool_bf, adj_bf]
    for wcat, vecs in packed_layers:
        flat.extend((wcat, vecs))
    flat.extend(head_pack)

    vmem = pl.BlockSpec(memory_space=pltpu.MemorySpace.VMEM)
    in_specs = ([vmem, vmem, vmem, pl.BlockSpec(memory_space=pl.ANY)]
                + [vmem] * (len(flat) - 4))

    # Rough resident-VMEM estimate -> generation-aware limit (review item).
    resident = (2 * tile_r * V * 2                       # adj double buffer (bf16)
                + V * dmax * 4                           # nbr scratch (f32)
                + sum(int(x.size) * x.dtype.itemsize
                      for x in flat if x is not adj_bf)  # resident inputs
                + M * total_out * 4)                     # output
    vmem_limit = int(min(0.75 * vmem_phys,
                         max(32 * 1024 * 1024, 2 * resident + 8 * 1024 * 1024)))

    out12 = pl.pallas_call(
        functools.partial(_gcc_kernel, num_layers, panels),
        out_shape=jax.ShapeDtypeStruct((M, total_out), jnp.float32),
        in_specs=in_specs,
        out_specs=vmem,
        scratch_shapes=[
            pltpu.VMEM((2, tile_r, V), jnp.bfloat16),   # adj panel double buffer
            pltpu.SemaphoreType.DMA((2,)),              # one DMA sem per slot
            pltpu.VMEM((V, dmax), jnp.float32),         # nbr = adj @ (h @ w1)
        ],
        compiler_params=pltpu.CompilerParams(vmem_limit_bytes=vmem_limit),
    )(*flat)

    # Split the single lane-dense output back into the three heads.
    out_style = out12[:, 0:3]
    out_functionality = out12[:, 3:7]
    out_aesthetics = out12[:, 7:12]
    return [out_style, out_functionality, out_aesthetics]


def init_params(key):
    """Deterministic synthetic init matching the module's shapes.
    Linear weights ~ N(0, 0.01), biases 0; BN gamma=1, beta=0 (fresh init)."""
    dims = [INPUT_MESH_FEATS] + HIDDEN_DIMS
    params = {"layers": [], "heads": []}
    keys = jax.random.split(key, 2 * (len(dims) - 1) + 6)
    ki = 0
    for i in range(len(dims) - 1):
        din, dout = dims[i], dims[i + 1]
        w0 = 0.01 * jax.random.normal(keys[ki], (din, dout), jnp.float32); ki += 1
        w1 = 0.01 * jax.random.normal(keys[ki], (din, dout), jnp.float32); ki += 1
        b0 = jnp.zeros((1, dout), jnp.float32)
        b1 = jnp.zeros((1, dout), jnp.float32)
        gamma = jnp.ones((1, dout), jnp.float32)
        beta = jnp.zeros((1, dout), jnp.float32)
        params["layers"].append((w0, b0, w1, b1, gamma, beta))
    neurdims = dims[-1]
    for out_dim in HEAD_OUT_DIMS:  # style / functionality / aesthetics
        wa = 0.01 * jax.random.normal(keys[ki], (neurdims, NEURDIMS2), jnp.float32); ki += 1
        ba = jnp.zeros((1, NEURDIMS2), jnp.float32)
        wb = 0.01 * jax.random.normal(keys[ki], (NEURDIMS2, out_dim), jnp.float32); ki += 1
        bb = jnp.zeros((1, out_dim), jnp.float32)
        params["heads"].append((wa, ba, wb, bb))
    return params


def reference(verts, adj, pool, params):
    """Pure-JAX f32 reference of the same math (unpacked params)."""
    h = verts
    for (w0, b0, w1, b1, gamma, beta) in params["layers"]:
        x = h @ w0 + b0 + adj @ (h @ w1 + b1)
        mu = jnp.mean(x, axis=0, keepdims=True)
        var = jnp.mean((x - mu) ** 2, axis=0, keepdims=True)
        h = jnp.maximum((x - mu) / jnp.sqrt(var + BN_EPS) * gamma + beta, 0.0)
    pooled = pool @ h
    outs = []
    for (wa, ba, wb, bb) in params["heads"]:
        a = jnp.maximum(pooled @ wa + ba, 0.0)
        outs.append(a @ wb + bb)
    return outs


if __name__ == "__main__":
    key = jax.random.PRNGKey(0)
    kv, kp = jax.random.split(key, 2)

    # Two small meshes packed together (like pytorch3d verts_packed / edges_packed).
    counts = [10, 6]
    V = sum(counts)
    M = len(counts)

    verts = jax.random.normal(kv, (V, INPUT_MESH_FEATS), jnp.float32)

    # Random within-mesh undirected edges.
    np.random.seed(0)
    edge_list = []
    offset = 0
    for c in counts:
        for _ in range(2 * c):
            a, b = np.random.randint(0, c, size=2)
            if a != b:
                edge_list.append((offset + a, offset + b))
        offset += c
    edges = jnp.asarray(edge_list, dtype=jnp.int32)

    adj = jnp.zeros((V, V), jnp.float32)
    adj = adj.at[edges[:, 0], edges[:, 1]].add(1.0)
    adj = adj.at[edges[:, 1], edges[:, 0]].add(1.0)

    pool = jnp.zeros((M, V), jnp.float32)
    off = 0
    for m, c in enumerate(counts):
        pool = pool.at[m, off:off + c].set(1.0 / c)
        off += c

    params = init_params(kp)

    outs = gcc_forward(verts, adj, pool, params)
    outs = jax.block_until_ready(outs)

    refs = reference(verts, adj, pool, params)
    for o, r in zip(outs, refs):
        assert o.shape == r.shape, (o.shape, r.shape)
        # bf16 MXU operands with f32 accumulation vs. pure-f32 reference.
        assert bool(jnp.allclose(o, r, atol=1e-3, rtol=2e-2))

    print("KERNEL_OK")
</pallas_src>

<mosaic_0001>
module attributes {stable_mosaic.version = 11 : i64} {
  func.func @_gcc_kernel(%arg0: memref<16x3xf32, #tpu.memory_space<vmem>>, %arg1: memref<16x1xf32, #tpu.memory_space<vmem>>, %arg2: memref<2x16xbf16, #tpu.memory_space<vmem>>, %arg3: memref<16x16xbf16, #tpu.memory_space<any>>, %arg4: memref<3x32xf32, #tpu.memory_space<vmem>>, %arg5: memref<4x16xf32, #tpu.memory_space<vmem>>, %arg6: memref<16x64xbf16, #tpu.memory_space<vmem>>, %arg7: memref<4x32xf32, #tpu.memory_space<vmem>>, %arg8: memref<32x768xbf16, #tpu.memory_space<vmem>>, %arg9: memref<1x768xf32, #tpu.memory_space<vmem>>, %arg10: memref<768x12xbf16, #tpu.memory_space<vmem>>, %arg11: memref<1x12xf32, #tpu.memory_space<vmem>>, %arg12: memref<2x12xf32, #tpu.memory_space<vmem>>, %arg13: memref<2x16x16xbf16, #tpu.memory_space<vmem>>, %arg14: memref<2x!tpu.dma_semaphore, #tpu.memory_space<semaphore_mem>>, %arg15: memref<16x32xf32, #tpu.memory_space<vmem>>) attributes {dimension_semantics = [], scalar_prefetch = 0 : i64, scratch_operands = 3 : i64, tpu.core_type = #tpu.core_type<tc>} {
    %c0 = arith.constant 0 : index
    %c0_0 = arith.constant 0 : index
    %0 = vector.load %arg0[%c0, %c0_0] : memref<16x3xf32, #tpu.memory_space<vmem>>, vector<16x3xf32>
    %c0_1 = arith.constant 0 : index
    %c0_2 = arith.constant 0 : index
    %1 = vector.load %arg1[%c0_1, %c0_2] : memref<16x1xf32, #tpu.memory_space<vmem>>, vector<16x1xf32>
    %c0_3 = arith.constant 0 : index
    %c0_4 = arith.constant 0 : index
    %2 = vector.load %arg4[%c0_3, %c0_4] : memref<3x32xf32, #tpu.memory_space<vmem>>, vector<3x32xf32>
    %c0_5 = arith.constant 0 : index
    %c0_6 = arith.constant 0 : index
    %3 = vector.load %arg5[%c0_5, %c0_6] : memref<4x16xf32, #tpu.memory_space<vmem>>, vector<4x16xf32>
    %c0_i32 = arith.constant 0 : i32
    %c0_i32_7 = arith.constant 0 : i32
    %c0_i32_8 = arith.constant 0 : i32
    %c0_i32_9 = arith.constant 0 : i32
    %4 = tpu.memref_slice %arg13[%c0_i32, %c0_i32_8, %c0_i32_9] : memref<2x16x16xbf16, #tpu.memory_space<vmem>> -> memref<1x16x16xbf16, #tpu.memory_space<vmem>>
    %5 = tpu.memref_squeeze %4 : memref<1x16x16xbf16, #tpu.memory_space<vmem>> -> memref<16x16xbf16, #tpu.memory_space<vmem>>
    %6 = tpu.memref_slice %arg14[%c0_i32_7] : memref<2x!tpu.dma_semaphore, #tpu.memory_space<semaphore_mem>> -> memref<1x!tpu.dma_semaphore, #tpu.memory_space<semaphore_mem>>
    %7 = tpu.memref_squeeze %6 : memref<1x!tpu.dma_semaphore, #tpu.memory_space<semaphore_mem>> -> memref<!tpu.dma_semaphore, #tpu.memory_space<semaphore_mem>>
    tpu.enqueue_dma source(%arg3 : memref<16x16xbf16, #tpu.memory_space<any>>) target(%5 : memref<16x16xbf16, #tpu.memory_space<vmem>>) target_semaphore(%7 : memref<!tpu.dma_semaphore, #tpu.memory_space<semaphore_mem>>)
    %8 = vector.extract_strided_slice %0 {offsets = [0, 0], sizes = [16, 1], strides = [1, 1]} : vector<16x3xf32> to vector<16x1xf32>
    %9 = vector.extract_strided_slice %2 {offsets = [0, 0], sizes = [1, 32], strides = [1, 1]} : vector<3x32xf32> to vector<1x32xf32>
    %10 = vector.broadcast %8 : vector<16x1xf32> to vector<16x32xf32>
    %11 = vector.broadcast %9 : vector<1x32xf32> to vector<16x32xf32>
    %12 = arith.mulf %10, %11 : vector<16x32xf32>
    %13 = vector.extract_strided_slice %0 {offsets = [0, 1], sizes = [16, 1], strides = [1, 1]} : vector<16x3xf32> to vector<16x1xf32>
    %14 = vector.extract_strided_slice %2 {offsets = [1, 0], sizes = [1, 32], strides = [1, 1]} : vector<3x32xf32> to vector<1x32xf32>
    %15 = vector.broadcast %13 : vector<16x1xf32> to vector<16x32xf32>
    %16 = vector.broadcast %14 : vector<1x32xf32> to vector<16x32xf32>
    %17 = arith.mulf %15, %16 : vector<16x32xf32>
    %18 = arith.addf %12, %17 : vector<16x32xf32>
    %19 = vector.extract_strided_slice %0 {offsets = [0, 2], sizes = [16, 1], strides = [1, 1]} : vector<16x3xf32> to vector<16x1xf32>
    %20 = vector.extract_strided_slice %2 {offsets = [2, 0], sizes = [1, 32], strides = [1, 1]} : vector<3x32xf32> to vector<1x32xf32>
    %21 = vector.broadcast %19 : vector<16x1xf32> to vector<16x32xf32>
    %22 = vector.broadcast %20 : vector<1x32xf32> to vector<16x32xf32>
    %23 = arith.mulf %21, %22 : vector<16x32xf32>
    %24 = arith.addf %18, %23 : vector<16x32xf32>
    %25 = vector.extract_strided_slice %24 {offsets = [0, 0], sizes = [16, 16], strides = [1, 1]} : vector<16x32xf32> to vector<16x16xf32>
    %26 = vector.extract_strided_slice %24 {offsets = [0, 16], sizes = [16, 16], strides = [1, 1]} : vector<16x32xf32> to vector<16x16xf32>
    %27 = arith.truncf %26 : vector<16x16xf32> to vector<16x16xbf16>
    %c0_i32_10 = arith.constant 0 : i32
    %c0_i32_11 = arith.constant 0 : i32
    %c0_i32_12 = arith.constant 0 : i32
    %c0_i32_13 = arith.constant 0 : i32
    %28 = tpu.memref_slice %arg13[%c0_i32_10, %c0_i32_12, %c0_i32_13] : memref<2x16x16xbf16, #tpu.memory_space<vmem>> -> memref<1x16x16xbf16, #tpu.memory_space<vmem>>
    %29 = tpu.memref_squeeze %28 : memref<1x16x16xbf16, #tpu.memory_space<vmem>> -> memref<16x16xbf16, #tpu.memory_space<vmem>>
    %30 = tpu.memref_slice %arg14[%c0_i32_11] : memref<2x!tpu.dma_semaphore, #tpu.memory_space<semaphore_mem>> -> memref<1x!tpu.dma_semaphore, #tpu.memory_space<semaphore_mem>>
    %31 = tpu.memref_squeeze %30 : memref<1x!tpu.dma_semaphore, #tpu.memory_space<semaphore_mem>> -> memref<!tpu.dma_semaphore, #tpu.memory_space<semaphore_mem>>
    tpu.wait_dma2 semaphore(%31 : memref<!tpu.dma_semaphore, #tpu.memory_space<semaphore_mem>>) src(%arg3 : memref<16x16xbf16, #tpu.memory_space<any>>) dst(%29 : memref<16x16xbf16, #tpu.memory_space<vmem>>)
    %c0_14 = arith.constant 0 : index
    %c0_15 = arith.constant 0 : index
    %c0_16 = arith.constant 0 : index
    %32 = vector.load %arg13[%c0_14, %c0_15, %c0_16] : memref<2x16x16xbf16, #tpu.memory_space<vmem>>, vector<1x16x16xbf16>
    %33 = vector.shape_cast %32 : vector<1x16x16xbf16> to vector<16x16xbf16>
    %cst = arith.constant dense<0.000000e+00> : vector<16x16xf32>
    %34 = tpu.matmul %33, %27, %cst {dimension_numbers = #tpu.dot_dimension_numbers<[1], [0], [0], [1], [0, 0, 1, 1], [], []>} : vector<16x16xbf16>, vector<16x16xbf16>, vector<16x16xf32> -> vector<16x16xf32>
    %c0_17 = arith.constant 0 : index
    %c0_18 = arith.constant 0 : index
    %35 = vector.load %arg15[%c0_17, %c0_18] : memref<16x32xf32, #tpu.memory_space<vmem>>, vector<16x16xf32>
    tpu.vector_store %arg15[%c0_17, %c0_18], %34 {strides = array<i32>} : memref<16x32xf32, #tpu.memory_space<vmem>>, vector<16x16xf32>,
    %c0_19 = arith.constant 0 : index
    %c0_20 = arith.constant 0 : index
    %36 = vector.load %arg15[%c0_19, %c0_20] : memref<16x32xf32, #tpu.memory_space<vmem>>, vector<16x16xf32>
    %37 = vector.extract_strided_slice %3 {offsets = [0, 0], sizes = [1, 16], strides = [1, 1]} : vector<4x16xf32> to vector<1x16xf32>
    %38 = vector.extract_strided_slice %3 {offsets = [1, 0], sizes = [1, 16], strides = [1, 1]} : vector<4x16xf32> to vector<1x16xf32>
    %39 = vector.extract_strided_slice %3 {offsets = [2, 0], sizes = [1, 16], strides = [1, 1]} : vector<4x16xf32> to vector<1x16xf32>
    %40 = vector.extract_strided_slice %3 {offsets = [3, 0], sizes = [1, 16], strides = [1, 1]} : vector<4x16xf32> to vector<1x16xf32>
    %41 = vector.broadcast %37 : vector<1x16xf32> to vector<16x16xf32>
    %42 = arith.addf %25, %41 : vector<16x16xf32>
    %43 = arith.addf %42, %36 : vector<16x16xf32>
    %44 = vector.broadcast %1 : vector<16x1xf32> to vector<16x16xf32>
    %45 = vector.broadcast %38 : vector<1x16xf32> to vector<16x16xf32>
    %46 = arith.mulf %44, %45 : vector<16x16xf32>
    %47 = arith.addf %43, %46 : vector<16x16xf32>
    %cst_21 = arith.constant dense<0.000000e+00> : vector<16xf32>
    %48 = vector.multi_reduction <add>, %47, %cst_21 [0] : vector<16x16xf32> to vector<16xf32>
    %49 = vector.shape_cast %48 : vector<16xf32> to vector<1x16xf32>
    %cst_22 = arith.constant 1.600000e+01 : f32
    %50 = vector.broadcast %cst_22 : f32 to vector<1x16xf32>
    %51 = arith.divf %49, %50 : vector<1x16xf32>
    %52 = vector.broadcast %51 : vector<1x16xf32> to vector<16x16xf32>
    %53 = arith.subf %47, %52 : vector<16x16xf32>
    %54 = vector.broadcast %51 : vector<1x16xf32> to vector<16x16xf32>
    %55 = arith.subf %47, %54 : vector<16x16xf32>
    %56 = arith.mulf %53, %55 : vector<16x16xf32>
    %cst_23 = arith.constant dense<0.000000e+00> : vector<16xf32>
    %57 = vector.multi_reduction <add>, %56, %cst_23 [0] : vector<16x16xf32> to vector<16xf32>
    %58 = vector.shape_cast %57 : vector<16xf32> to vector<1x16xf32>
    %cst_24 = arith.constant 1.600000e+01 : f32
    %59 = vector.broadcast %cst_24 : f32 to vector<1x16xf32>
    %60 = arith.divf %58, %59 : vector<1x16xf32>
    %cst_25 = arith.constant 9.99999974E-6 : f32
    %61 = vector.broadcast %cst_25 : f32 to vector<1x16xf32>
    %62 = arith.addf %60, %61 : vector<1x16xf32>
    %63 = math.rsqrt %62 : vector<1x16xf32>
    %64 = arith.mulf %39, %63 : vector<1x16xf32>
    %65 = vector.broadcast %51 : vector<1x16xf32> to vector<16x16xf32>
    %66 = arith.subf %47, %65 : vector<16x16xf32>
    %67 = vector.broadcast %64 : vector<1x16xf32> to vector<16x16xf32>
    %68 = arith.mulf %66, %67 : vector<16x16xf32>
    %69 = vector.broadcast %40 : vector<1x16xf32> to vector<16x16xf32>
    %70 = arith.addf %68, %69 : vector<16x16xf32>
    %cst_26 = arith.constant 0.000000e+00 : f32
    %71 = vector.broadcast %cst_26 : f32 to vector<16x16xf32>
    %72 = arith.maximumf %70, %71 : vector<16x16xf32>
    %c0_27 = arith.constant 0 : index
    %c0_28 = arith.constant 0 : index
    %73 = vector.load %arg6[%c0_27, %c0_28] : memref<16x64xbf16, #tpu.memory_space<vmem>>, vector<16x64xbf16>
    %c0_29 = arith.constant 0 : index
    %c0_30 = arith.constant 0 : index
    %74 = vector.load %arg7[%c0_29, %c0_30] : memref<4x32xf32, #tpu.memory_space<vmem>>, vector<4x32xf32>
    %c0_i32_31 = arith.constant 0 : i32
    %c0_i32_32 = arith.constant 0 : i32
    %c0_i32_33 = arith.constant 0 : i32
    %c0_i32_34 = arith.constant 0 : i32
    %75 = tpu.memref_slice %arg13[%c0_i32_31, %c0_i32_33, %c0_i32_34] : memref<2x16x16xbf16, #tpu.memory_space<vmem>> -> memref<1x16x16xbf16, #tpu.memory_space<vmem>>
    %76 = tpu.memref_squeeze %75 : memref<1x16x16xbf16, #tpu.memory_space<vmem>> -> memref<16x16xbf16, #tpu.memory_space<vmem>>
    %77 = tpu.memref_slice %arg14[%c0_i32_32] : memref<2x!tpu.dma_semaphore, #tpu.memory_space<semaphore_mem>> -> memref<1x!tpu.dma_semaphore, #tpu.memory_space<semaphore_mem>>
    %78 = tpu.memref_squeeze %77 : memref<1x!tpu.dma_semaphore, #tpu.memory_space<semaphore_mem>> -> memref<!tpu.dma_semaphore, #tpu.memory_space<semaphore_mem>>
    tpu.enqueue_dma source(%arg3 : memref<16x16xbf16, #tpu.memory_space<any>>) target(%76 : memref<16x16xbf16, #tpu.memory_space<vmem>>) target_semaphore(%78 : memref<!tpu.dma_semaphore, #tpu.memory_space<semaphore_mem>>)
    %79 = arith.truncf %72 : vector<16x16xf32> to vector<16x16xbf16>
    %cst_35 = arith.constant dense<0.000000e+00> : vector<16x64xf32>
    %80 = tpu.matmul %79, %73, %cst_35 {dimension_numbers = #tpu.dot_dimension_numbers<[1], [0], [0], [1], [0, 0, 1, 1], [], []>} : vector<16x16xbf16>, vector<16x64xbf16>, vector<16x64xf32> -> vector<16x64xf32>
    %81 = vector.extract_strided_slice %80 {offsets = [0, 0], sizes = [16, 32], strides = [1, 1]} : vector<16x64xf32> to vector<16x32xf32>
    %82 = vector.extract_strided_slice %80 {offsets = [0, 32], sizes = [16, 32], strides = [1, 1]} : vector<16x64xf32> to vector<16x32xf32>
    %83 = arith.truncf %82 : vector<16x32xf32> to vector<16x32xbf16>
    %c0_i32_36 = arith.constant 0 : i32
    %c0_i32_37 = arith.constant 0 : i32
    %c0_i32_38 = arith.constant 0 : i32
    %c0_i32_39 = arith.constant 0 : i32
    %84 = tpu.memref_slice %arg13[%c0_i32_36, %c0_i32_38, %c0_i32_39] : memref<2x16x16xbf16, #tpu.memory_space<vmem>> -> memref<1x16x16xbf16, #tpu.memory_space<vmem>>
    %85 = tpu.memref_squeeze %84 : memref<1x16x16xbf16, #tpu.memory_space<vmem>> -> memref<16x16xbf16, #tpu.memory_space<vmem>>
    %86 = tpu.memref_slice %arg14[%c0_i32_37] : memref<2x!tpu.dma_semaphore, #tpu.memory_space<semaphore_mem>> -> memref<1x!tpu.dma_semaphore, #tpu.memory_space<semaphore_mem>>
    %87 = tpu.memref_squeeze %86 : memref<1x!tpu.dma_semaphore, #tpu.memory_space<semaphore_mem>> -> memref<!tpu.dma_semaphore, #tpu.memory_space<semaphore_mem>>
    tpu.wait_dma2 semaphore(%87 : memref<!tpu.dma_semaphore, #tpu.memory_space<semaphore_mem>>) src(%arg3 : memref<16x16xbf16, #tpu.memory_space<any>>) dst(%85 : memref<16x16xbf16, #tpu.memory_space<vmem>>)
    %c0_40 = arith.constant 0 : index
    %c0_41 = arith.constant 0 : index
    %c0_42 = arith.constant 0 : index
    %88 = vector.load %arg13[%c0_40, %c0_41, %c0_42] : memref<2x16x16xbf16, #tpu.memory_space<vmem>>, vector<1x16x16xbf16>
    %89 = vector.shape_cast %88 : vector<1x16x16xbf16> to vector<16x16xbf16>
    %cst_43 = arith.constant dense<0.000000e+00> : vector<16x32xf32>
    %90 = tpu.matmul %89, %83, %cst_43 {dimension_numbers = #tpu.dot_dimension_numbers<[1], [0], [0], [1], [0, 0, 1, 1], [], []>} : vector<16x16xbf16>, vector<16x32xbf16>, vector<16x32xf32> -> vector<16x32xf32>
    %c0_44 = arith.constant 0 : index
    %c0_45 = arith.constant 0 : index
    %91 = vector.load %arg15[%c0_44, %c0_45] : memref<16x32xf32, #tpu.memory_space<vmem>>, vector<16x32xf32>
    tpu.vector_store %arg15[%c0_44, %c0_45], %90 {strides = array<i32>} : memref<16x32xf32, #tpu.memory_space<vmem>>, vector<16x32xf32>,
    %c0_46 = arith.constant 0 : index
    %c0_47 = arith.constant 0 : index
    %92 = vector.load %arg15[%c0_46, %c0_47] : memref<16x32xf32, #tpu.memory_space<vmem>>, vector<16x32xf32>
    %93 = vector.extract_strided_slice %74 {offsets = [0, 0], sizes = [1, 32], strides = [1, 1]} : vector<4x32xf32> to vector<1x32xf32>
    %94 = vector.extract_strided_slice %74 {offsets = [1, 0], sizes = [1, 32], strides = [1, 1]} : vector<4x32xf32> to vector<1x32xf32>
    %95 = vector.extract_strided_slice %74 {offsets = [2, 0], sizes = [1, 32], strides = [1, 1]} : vector<4x32xf32> to vector<1x32xf32>
    %96 = vector.extract_strided_slice %74 {offsets = [3, 0], sizes = [1, 32], strides = [1, 1]} : vector<4x32xf32> to vector<1x32xf32>
    %97 = vector.broadcast %93 : vector<1x32xf32> to vector<16x32xf32>
    %98 = arith.addf %81, %97 : vector<16x32xf32>
    %99 = arith.addf %98, %92 : vector<16x32xf32>
    %100 = vector.broadcast %1 : vector<16x1xf32> to vector<16x32xf32>
    %101 = vector.broadcast %94 : vector<1x32xf32> to vector<16x32xf32>
    %102 = arith.mulf %100, %101 : vector<16x32xf32>
    %103 = arith.addf %99, %102 : vector<16x32xf32>
    %cst_48 = arith.constant dense<0.000000e+00> : vector<32xf32>
    %104 = vector.multi_reduction <add>, %103, %cst_48 [0] : vector<16x32xf32> to vector<32xf32>
    %105 = vector.shape_cast %104 : vector<32xf32> to vector<1x32xf32>
    %cst_49 = arith.constant 1.600000e+01 : f32
    %106 = vector.broadcast %cst_49 : f32 to vector<1x32xf32>
    %107 = arith.divf %105, %106 : vector<1x32xf32>
    %108 = vector.broadcast %107 : vector<1x32xf32> to vector<16x32xf32>
    %109 = arith.subf %103, %108 : vector<16x32xf32>
    %110 = vector.broadcast %107 : vector<1x32xf32> to vector<16x32xf32>
    %111 = arith.subf %103, %110 : vector<16x32xf32>
    %112 = arith.mulf %109, %111 : vector<16x32xf32>
    %cst_50 = arith.constant dense<0.000000e+00> : vector<32xf32>
    %113 = vector.multi_reduction <add>, %112, %cst_50 [0] : vector<16x32xf32> to vector<32xf32>
    %114 = vector.shape_cast %113 : vector<32xf32> to vector<1x32xf32>
    %cst_51 = arith.constant 1.600000e+01 : f32
    %115 = vector.broadcast %cst_51 : f32 to vector<1x32xf32>
    %116 = arith.divf %114, %115 : vector<1x32xf32>
    %cst_52 = arith.constant 9.99999974E-6 : f32
    %117 = vector.broadcast %cst_52 : f32 to vector<1x32xf32>
    %118 = arith.addf %116, %117 : vector<1x32xf32>
    %119 = math.rsqrt %118 : vector<1x32xf32>
    %120 = arith.mulf %95, %119 : vector<1x32xf32>
    %121 = vector.broadcast %107 : vector<1x32xf32> to vector<16x32xf32>
    %122 = arith.subf %103, %121 : vector<16x32xf32>
    %123 = vector.broadcast %120 : vector<1x32xf32> to vector<16x32xf32>
    %124 = arith.mulf %122, %123 : vector<16x32xf32>
    %125 = vector.broadcast %96 : vector<1x32xf32> to vector<16x32xf32>
    %126 = arith.addf %124, %125 : vector<16x32xf32>
    %cst_53 = arith.constant 0.000000e+00 : f32
    %127 = vector.broadcast %cst_53 : f32 to vector<16x32xf32>
    %128 = arith.maximumf %126, %127 : vector<16x32xf32>
    %c0_54 = arith.constant 0 : index
    %c0_55 = arith.constant 0 : index
    %129 = vector.load %arg2[%c0_54, %c0_55] : memref<2x16xbf16, #tpu.memory_space<vmem>>, vector<2x16xbf16>
    %130 = arith.truncf %128 : vector<16x32xf32> to vector<16x32xbf16>
    %cst_56 = arith.constant dense<0.000000e+00> : vector<2x32xf32>
    %131 = tpu.matmul %129, %130, %cst_56 {dimension_numbers = #tpu.dot_dimension_numbers<[1], [0], [0], [1], [0, 0, 1, 1], [], []>} : vector<2x16xbf16>, vector<16x32xbf16>, vector<2x32xf32> -> vector<2x32xf32>
    %132 = arith.truncf %131 : vector<2x32xf32> to vector<2x32xbf16>
    %c0_57 = arith.constant 0 : index
    %c0_58 = arith.constant 0 : index
    %133 = vector.load %arg8[%c0_57, %c0_58] : memref<32x768xbf16, #tpu.memory_space<vmem>>, vector<32x768xbf16>
    %cst_59 = arith.constant dense<0.000000e+00> : vector<2x768xf32>
    %134 = tpu.matmul %132, %133, %cst_59 {dimension_numbers = #tpu.dot_dimension_numbers<[1], [0], [0], [1], [0, 0, 1, 1], [], []>} : vector<2x32xbf16>, vector<32x768xbf16>, vector<2x768xf32> -> vector<2x768xf32>
    %c0_60 = arith.constant 0 : index
    %c0_61 = arith.constant 0 : index
    %135 = vector.load %arg9[%c0_60, %c0_61] : memref<1x768xf32, #tpu.memory_space<vmem>>, vector<1x768xf32>
    %136 = vector.broadcast %135 : vector<1x768xf32> to vector<2x768xf32>
    %137 = arith.addf %134, %136 : vector<2x768xf32>
    %cst_62 = arith.constant 0.000000e+00 : f32
    %138 = vector.broadcast %cst_62 : f32 to vector<2x768xf32>
    %139 = arith.maximumf %137, %138 : vector<2x768xf32>
    %140 = arith.truncf %139 : vector<2x768xf32> to vector<2x768xbf16>
    %c0_63 = arith.constant 0 : index
    %c0_64 = arith.constant 0 : index
    %141 = vector.load %arg10[%c0_63, %c0_64] : memref<768x12xbf16, #tpu.memory_space<vmem>>, vector<768x12xbf16>
    %cst_65 = arith.constant dense<0.000000e+00> : vector<2x12xf32>
    %142 = tpu.matmul %140, %141, %cst_65 {dimension_numbers = #tpu.dot_dimension_numbers<[1], [0], [0], [1], [0, 0, 1, 1], [], []>} : vector<2x768xbf16>, vector<768x12xbf16>, vector<2x12xf32> -> vector<2x12xf32>
    %c0_66 = arith.constant 0 : index
    %c0_67 = arith.constant 0 : index
    %143 = vector.load %arg11[%c0_66, %c0_67] : memref<1x12xf32, #tpu.memory_space<vmem>>, vector<1x12xf32>
    %144 = vector.broadcast %143 : vector<1x12xf32> to vector<2x12xf32>
    %145 = arith.addf %142, %144 : vector<2x12xf32>
    %c0_68 = arith.constant 0 : index
    %c0_69 = arith.constant 0 : index
    %146 = vector.load %arg12[%c0_68, %c0_69] : memref<2x12xf32, #tpu.memory_space<vmem>>, vector<2x12xf32>
    tpu.vector_store %arg12[%c0_68, %c0_69], %145 {strides = array<i32>} : memref<2x12xf32, #tpu.memory_space<vmem>>, vector<2x12xf32>,
    return
  }
}

</mosaic_0001>

<bundles_post_ra>
// kernel: tpu_custom_call.1
= control target key start
LH: loop header
LB: loop body
LE: loop exit
PB: predicated region body
PF: predicated region fallthrough
CT: control target
= control target key end

     0   :  { %17 = vsyncpa [#allocation6], 0  ;;  %s2003_s0 = inlined_call_operand.vmem [shape: f32[16,3], index: 0, kind: input, shape index: {}]   ;;  %s2004_s1 = inlined_call_operand.vmem [shape: f32[16,1], index: 1, kind: input, shape index: {}]   ;;  %s2005_s2 = inlined_call_operand.vmem [shape: bf16[2,16], index: 2, kind: input, shape index: {}]   ;;  %s2006_s3 = inlined_call_operand.vmem [shape: bf16[16,16], index: 3, kind: input, shape index: {}]   ;;  %s2007_s4 = inlined_call_operand.vmem [shape: f32[3,32], index: 4, kind: input, shape index: {}]   ;;  %s2008_s5 = inlined_call_operand.vmem [shape: f32[4,16], index: 5, kind: input, shape index: {}]   ;;  %s2009_s6 = inlined_call_operand.vmem [shape: bf16[16,64], index: 6, kind: input, shape index: {}]   ;;  %s2010_s7 = inlined_call_operand.vmem [shape: f32[4,32], index: 7, kind: input, shape index: {}]   ;;  %s2011_s8 = inlined_call_operand.vmem [shape: bf16[32,768], index: 8, kind: input, shape index: {}]   ;;  %s2012_s9 = inlined_call_operand.vmem [shape: f32[1,768], index: 9, kind: input, shape index: {}]   ;;  %s2013_s10 = inlined_call_operand.vmem [shape: bf16[768,12], index: 10, kind: input, shape index: {}]   ;;  %s2014_s11 = inlined_call_operand.vmem [shape: f32[1,12], index: 11, kind: input, shape index: {}]   ;;  %s2015_s12 = inlined_call_operand.hbm [shape: f32[2,12], index: 12, kind: output, shape index: {}]  }
   0x1   :  { %v41_v0 = vld [vmem:[%s2003_s0] sm:$0xff]  ;;  %v42_v1 = vld [vmem:[%s2003_s0 + $0x8] sm:$0xff] }
   0x2   :  { %v43_v2 = vld [vmem:[%s2004_s1] sm:$0xff]  ;;  %v44_v3 = vld [vmem:[%s2004_s1 + $0x8] sm:$0xff] }
   0x3   :  { %v45_v4 = vld [vmem:[%s2007_s4] sm:$0x7] }
   0x4   :  { %v1690_v5 = vld [vmem:[%s2008_s5] sm:$0xf] }
   0x5   :  { %v79_v6 = vld [vmem:[%s2006_s3] sm:$0xff] }
   0x6   :  { %88 = vsyncadd [#allocation3], 128  ;;  %v1599_v7 = vmov 1   ;;  %v1600_v8 = vmov 0   ;;  %v1601_v9 = vmov 2   ;;  %v99_v10 = vlaneseq }
   0x7   :  { %1496 = vset.pattern.permute.xlu1 %v1599_v7  ;;  %1495 = vset.pattern.permute.xlu0 %v1600_v8 }
   0x8   :  { %106 = vperm.xlu1 %1496, %v41_v0   ;;  %91 = vperm.xlu0 %1495, %v41_v0   ;;  %v1696_v11 = vshrl.u32 %v99_v10, 7 }
   0xa   :  { %v1699_v12 = vsub.s32 1, %v1696_v11  ;;  %v1702_v13 = vsub.s32 0, %v1696_v11  ;;  %v1705_v16 = vsub.s32 2, %v1696_v11 }
   0xc   :  { %110 = vperm.xlu1 %1496, %v42_v1   ;;  %96 = vperm.xlu0 %1495, %v42_v1   ;;  %v116_v17 = vrot.slane %v45_v4, %v1699_v12  ;;  %v102_v18 = vrot.slane %v45_v4, %v1702_v13  ;;  %v132_v21 = vrot.slane %v45_v4, %v1705_v16 }
  0x10   :  { %1498 = vset.pattern.permute.xlu1 %v1601_v9  ;;  %1497 = vset.pattern.permute.xlu0 %v1601_v9 }
  0x11   :  { %126 = vperm.xlu1 %1498, %v42_v1   ;;  %122 = vperm.xlu0 %1497, %v41_v0  }
  0x15   :  { %1499 = vset.pattern.permute.xlu0 %v1600_v8  ;;  %1500 = vset.pattern.permute.xlu1 %v1600_v8 }
  0x87   :  { %v107_v14 = vpop.permute.xlu1 %106  ;;  %v92_v15 = vpop.permute.xlu0 %91 }
  0x88   :  { %v117_v22 = vmul.f32 %v116_v17, %v107_v14  ;;  %v103_v23 = vmul.f32 %v102_v18, %v92_v15 }
  0x8a   :  { %v119_v28 = vadd.f32 %v117_v22, %v103_v23 }
  0x8b   :  { %v111_v19 = vpop.permute.xlu1 %110  ;;  %v97_v20 = vpop.permute.xlu0 %96 }
  0x8c   :  { %v118_v24 = vmul.f32 %v116_v17, %v111_v19  ;;  %v104_v25 = vmul.f32 %v102_v18, %v97_v20 }
  0x8e   :  { %v120_v29 = vadd.f32 %v118_v24, %v104_v25 }
  0x90   :  { %v127_v26 = vpop.permute.xlu1 %126  ;;  %v123_v27 = vpop.permute.xlu0 %122 }
  0x91   :  { %v134_v30 = vmul.f32 %v132_v21, %v127_v26  ;;  %v133_v31 = vmul.f32 %v132_v21, %v123_v27 }
  0x93   :  { %v136_v32 = vadd.f32 %v134_v30, %v120_v29  ;;  %v135_v33 = vadd.f32 %v133_v31, %v119_v28 }
  0x95   :  { %v137_v34 = vpack.c.bf16 %v136_v32, %v135_v33 }
  0x96   :  { %1593 = dma.done.wait [#allocation3], 128 }
  0x97   :  { %1594 = vsyncadd [#allocation3], 4294967168  ;;  %s1602_s0 = smov 112   ;;  %v1603_v35 = vmov 0.0   ;;  %vm1604_vm0 = vmmov 0   ;;  %211 = vperm.xlu1 %1500, %v44_v3   ;;  %v1733_v39 = vld [vmem:[%s2006_s3] sm:$0xff]  ;;  %v199_v43 = vrot.slane %v1690_v5, %v1702_v13  ;;  %v217_v46 = vrot.slane %v1690_v5, %v1699_v12 }
  0x98   :  { %144 = vrot.lane.b32.xlu0 %v137_v34, %s1602_s0  ;;  %1463 = vmatprep.subr.bf16.mxu0 %v1603_v35  ;;  %v1718_v36 = vld [vmem:[%s2009_s6] sm:$0xf]  ;;  %v1723_v37 = vld [vmem:[%s2009_s6 + $0x4] sm:$0xf]  ;;  %vm147_vm1 = vcmask 130048   ;;  %v1753_v26 = vsub.s32 3, %v1696_v11 }
  0x99   :  { %1465 = vmatprep.mubr.msk.bf16.mxu0 %vm1604_vm0, %v1603_v35  ;;  %v1728_v38 = vld [vmem:[%s2010_s7] sm:$0xf]  ;;  %v200_v48 = vadd.f32 %v199_v43, %v135_v33  ;;  %v201_v51 = vadd.f32 %v199_v43, %v136_v32 }
  0x9a   :  { %v259_v30 = vrot.slane %v1690_v5, %v1753_v26 }
  0x9c   :  { %206 = vperm.xlu0 %1499, %v43_v2  }
 0x10a   :  { %v145_v40 = vpop.permute.xlu0 %144 }
 0x10b   :  { %1464 = vmatpush3.bf16.msra.mxu0 %v145_v40 }
 0x10e   :  { %1466 = vmatmul.mubr.msk.bf16.vlgmr.msra.gmra.mrb[0].mxu0 %vm147_vm1, %v79_v6 }
 0x116   :  { %v1744_v49 = vpop.permute.xlu1 %211 }
 0x117   :  { %v219_v54 = vmul.f32 %v217_v46, %v1744_v49 }
 0x11b   :  { %v1742_v47 = vpop.permute.xlu0 %206 }
 0x11c   :  { %v218_v50 = vmul.f32 %v217_v46, %v1742_v47 }
 0x1e1   :  { %v185_v41 = vpop.f32.mrb[0].mxu0 }
 0x1e2   :  { %192 = vst.msk [vmem:[#allocation4] sm:$0xff] %vm147_vm1, %v185_v41  ;;  %v1467_v42 = vpop.f32.mrb[1].mxu0 }
 0x1e3   :  { %v188_v44 = vpop.f32.mrb[2].mxu0 }
 0x1e4   :  { %193 = vst.msk [vmem:[#allocation4 + $0x8] sm:$0xff] %vm147_vm1, %v188_v44  ;;  %v1468_v45 = vpop.f32.mrb[3].mxu0 }
 0x1e9   :  { %v194_v52 = vld [vmem:[#allocation4] sm:$0xff] }
 0x1ea   :  { %v202_v53 = vadd.f32 %v200_v48, %v194_v52 }
 0x1eb   :  { %v195_v55 = vld [vmem:[#allocation4 + $0x8] sm:$0xff] }
 0x1ec   :  { %v220_v56 = vadd.f32 %v218_v50, %v202_v53  ;;  %v203_v57 = vadd.f32 %v201_v51, %v195_v55 }
 0x1ee   :  { %v221_v58 = vadd.f32 %v219_v54, %v203_v57  ;;  %v222_v59 = vsel %vm147_vm1, %v220_v56, 0.0 }
 0x1f0   :  { %v223_v60 = vsel %vm147_vm1, %v221_v58, 0.0 }
 0x1f1   :  { %v224_v61 = vadd.f32 %v223_v60, %v222_v59 }
 0x1f3   :  { %v225_v62 = vrot.slane %v224_v61, 4 }
 0x1f5   :  { %v226_v63 = vadd.f32 %v225_v62, %v224_v61 }
 0x1f7   :  { %v227_v0 = vrot.slane %v226_v63, 2 }
 0x1f9   :  { %v228_v1 = vadd.f32 %v227_v0, %v226_v63 }
 0x1fb   :  { %v229_v2 = vrot.slane %v228_v1, 1 }
 0x1fd   :  { %v230_v3 = vadd.f32 %v229_v2, %v228_v1 }
 0x1ff   :  { %v232_v4 = vmul.f32 0.0625, %v230_v3 }
 0x201   :  { %v233_v6 = vsub.f32 %v220_v56, %v232_v4  ;;  %v234_v7 = vsub.f32 %v221_v58, %v232_v4 }
 0x203   :  { %v235_v9 = vmul.f32 %v233_v6, %v233_v6  ;;  %v236_v10 = vmul.f32 %v234_v7, %v234_v7 }
 0x205   :  { %v237_v14 = vsel %vm147_vm1, %v235_v9, 0.0  ;;  %v238_v15 = vsel %vm147_vm1, %v236_v10, 0.0 }
 0x206   :  { %v239_v17 = vadd.f32 %v238_v15, %v237_v14 }
 0x208   :  { %v240_v18 = vrot.slane %v239_v17, 4 }
 0x20a   :  { %v241_v19 = vadd.f32 %v240_v18, %v239_v17 }
 0x20c   :  { %v242_v20 = vrot.slane %v241_v19, 2 }
 0x20e   :  { %v243_v21 = vadd.f32 %v242_v20, %v241_v19 }
 0x210   :  { %v244_v22 = vrot.slane %v243_v21, 1 }
 0x212   :  { %v245_v23 = vadd.f32 %v244_v22, %v243_v21 }
 0x214   :  { %v246_v24 = vmul.f32 0.0625, %v245_v23 }
 0x216   :  { %v247_v25 = vadd.f32 1e-05, %v246_v24 }
 0x218   :  { %1501 = vrsqrt.f32 %v247_v25 }
 0x222   :  { %v1502_v27 = vpop.eup %1501 }
 0x223   :  { %v249_v28 = vmul.f32 %v1502_v27, %v1690_v5 }
 0x225   :  { %v253_v29 = vrot.slane %v249_v28, %v1705_v16 }
 0x227   :  { %v254_v31 = vmul.f32 %v253_v29, %v233_v6  ;;  %v255_v32 = vmul.f32 %v253_v29, %v234_v7 }
 0x229   :  { %v260_v33 = vadd.f32 %v259_v30, %v254_v31  ;;  %v261_v34 = vadd.f32 %v259_v30, %v255_v32 }
 0x22b   :  { %v262_v40 = vmax.f32 %v260_v33, 0.0  ;;  %v263_v41 = vmax.f32 %v261_v34, 0.0 }
 0x22c   :  { %308 = vsyncadd [#allocation3], 128  ;;  %1469 = vmatprep.subr.bf16.mxu0 %v1603_v35  ;;  %v1319_v42 = vcombine.low %v1718_v36, %v1723_v37  ;;  %1471 = vmatprep.mubr.msk.bf16.mxu0 %vm1604_vm0, %v1603_v35 }
 0x22d   :  { %v309_v43 = vpack.c.bf16 %v263_v41, %v262_v40 }
 0x22e   :  { %1470 = vmatpush3.bf16.msra.mxu0 %v1319_v42 }
 0x22f   :  { %1475 = vmatprep.subr.bf16.mxu0 %v1603_v35 }
 0x231   :  { %1472 = vmatmul.mubr.msk.bf16.vlgmr.msra.gmra.mrb[4].mxu0 %vm147_vm1, %v309_v43 }
 0x232   :  { %1477 = vmatprep.mubr.msk.bf16.mxu0 %vm1604_vm0, %v1603_v35 }
 0x304   :  { %v353_v5 = vpop.f32.mrb[4].mxu0 }
 0x305   :  { %v1473_v44 = vpop.f32.mrb[5].mxu0 }
 0x306   :  { %v356_v45 = vpop.f32.mrb[6].mxu0 }
 0x307   :  { %v360_v46 = vpack.c.bf16 %v356_v45, %v353_v5  ;;  %v1474_v48 = vpop.f32.mrb[7].mxu0 }
 0x308   :  { %1595 = dma.done.wait [#allocation3], 128 }
 0x309   :  { %1596 = vsyncadd [#allocation3], 4294967168  ;;  %s1605_s3 = smov 96   ;;  %1481 = vmatprep.subr.bf16.mxu1 %v1603_v35  ;;  %1483 = vmatprep.mubr.msk.bf16.mxu1 %vm1604_vm0, %v1603_v35  ;;  %v1503_v37 = vld [vmem:[%s2011_s8] ss:$24 sps:$4 sm:$0xff]   ;;  %vm412_vm2 = vcmask 261120   ;;  %v420_v53 = vrot.slane %v1728_v38, %v1702_v13  ;;  %v428_v56 = vrot.slane %v1728_v38, %v1699_v12  ;;  %v469_v41 = vrot.slane %v1728_v38, %v1753_v26 }
 0x30a   :  { %365 = vrot.lane.b32.xlu0 %v360_v46, %s1605_s3  ;;  %v1505_v50 = vld [vmem:[%s2011_s8 + $0x4] ss:$24 sps:$4 sm:$0xff]   ;;  %v1511_v51 = vld [vmem:[%s2011_s8 + $0x34] ss:$24 sps:$4 sm:$0xff]   ;;  %v1509_v35 = vld [vmem:[%s2011_s8 + $0x30] ss:$24 sps:$4 sm:$0xff]  }
 0x30b   :  { %v421_v57 = vadd.f32 %v420_v53, %v353_v5  ;;  %v422_v58 = vadd.f32 %v420_v53, %v356_v45  ;;  %v429_v59 = vmul.f32 %v428_v56, %v1742_v47  ;;  %v430_v62 = vmul.f32 %v428_v56, %v1744_v49  ;;  %v1508_v48 = vld [vmem:[%s2011_s8 + $0xc] ss:$24 sps:$4 sm:$0xff]   ;;  %v1515_v53 = vld [vmem:[%s2011_s8 + $0x10] ss:$24 sps:$4 sm:$0xff]  }
 0x30c   :  { %v1520_v56 = vld [vmem:[%s2011_s8 + $0x44] ss:$24 sps:$4 sm:$0xff]   ;;  %vm1273_vm3 = vcmask 91136  }
 0x37c   :  { %v366_v36 = vpop.permute.xlu0 %365 }
 0x37d   :  { %1476 = vmatpush3.bf16.msra.mxu0 %v366_v36 }
 0x37e   :  { %627 = vmatprep.subr.bf16.mxu0 %v1505_v50  ;;  %v1514_v50 = vld [vmem:[%s2011_s8 + $0x3c] ss:$24 sps:$4 sm:$0xff]  }
 0x380   :  { %1478 = vmatmul.mubr.msk.bf16.vlgmr.msra.gmra.mrb[8].mxu0 %vm147_vm1, %v1733_v39 }
 0x381   :  { %659 = vmatprep.mubr.bf16.mxu0 %v1600_v8  ;;  %628 = vmatpush1.bf16.msra.mxu0 %v1503_v37  ;;  %v474_v37 = vld [vmem:[%s2005_s2] sm:$0x1] }
 0x382   :  { %629 = vmatprep.subr.bf16.mxu0 %v1511_v51  ;;  %v1512_v51 = vld [vmem:[%s2011_s8 + $0x38] ss:$24 sps:$4 sm:$0xff]  }
 0x385   :  { %630 = vmatpush1.bf16.msra.mxu0 %v1509_v35  ;;  %v1517_v35 = vld [vmem:[%s2011_s8 + $0x14] ss:$24 sps:$4 sm:$0xff]  }
 0x386   :  { %709 = vmatprep.subr.bf16.mxu0 %v1517_v35 }
 0x453   :  { %v405_v39 = vpop.f32.mrb[8].mxu0 }
 0x454   :  { %413 = vst.msk [vmem:[#allocation4] sm:$0xff] %vm412_vm2, %v405_v39  ;;  %v1479_v52 = vpop.f32.mrb[9].mxu0  ;;  %v1521_v39 = vld [vmem:[%s2013_s10 + $0x40] sm:$0xff]  }
 0x455   :  { %v408_v54 = vpop.f32.mrb[10].mxu0 }
 0x456   :  { %414 = vst.msk [vmem:[#allocation4 + $0x8] sm:$0xff] %vm412_vm2, %v408_v54  ;;  %v1480_v55 = vpop.f32.mrb[11].mxu0 }
 0x45b   :  { %v415_v60 = vld [vmem:[#allocation4] sm:$0xff] }
 0x45c   :  { %v423_v61 = vadd.f32 %v421_v57, %v415_v60  ;;  %v1522_v57 = vld [vmem:[%s2013_s10] sm:$0xff]  }
 0x45d   :  { %v416_v63 = vld [vmem:[#allocation4 + $0x8] sm:$0xff] }
 0x45e   :  { %v424_v0 = vadd.f32 %v422_v58, %v416_v63  ;;  %v431_v1 = vadd.f32 %v429_v59, %v423_v61  ;;  %v1525_v59 = vld [vmem:[%s2013_s10 + $0x48] sm:$0xff]   ;;  %v1518_v61 = vld [vmem:[%s2011_s8 + $0x40] ss:$24 sps:$4 sm:$0xff]  }
 0x45f   :  { %v1526_v63 = vld [vmem:[%s2013_s10 + $0x8] sm:$0xff]  }
 0x460   :  { %v432_v2 = vadd.f32 %v430_v62, %v424_v0  ;;  %v433_v3 = vsel %vm412_vm2, %v431_v1, 0.0  ;;  %v1523_v62 = vld [vmem:[%s2013_s10 + $0xc0] sm:$0xff]   ;;  %v1529_v0 = vld [vmem:[%s2013_s10 + $0x50] sm:$0xff]  }
 0x462   :  { %v434_v4 = vsel %vm412_vm2, %v432_v2, 0.0 }
 0x463   :  { %v435_v6 = vadd.f32 %v434_v4, %v433_v3  ;;  %v1533_v3 = vld [vmem:[%s2013_s10 + $0x58] sm:$0xff]   ;;  %v1528_v4 = vld [vmem:[%s2013_s10 + $0x88] sm:$0xff]  }
 0x465   :  { %v436_v7 = vrot.slane %v435_v6, 4 }
 0x467   :  { %v437_v9 = vadd.f32 %v436_v7, %v435_v6  ;;  %v1531_v6 = vld [vmem:[%s2013_s10 + $0xd0] sm:$0xff]   ;;  %v1534_v7 = vld [vmem:[%s2013_s10 + $0x18] sm:$0xff]  }
 0x469   :  { %v438_v10 = vrot.slane %v437_v9, 2 }
 0x46b   :  { %v439_v14 = vadd.f32 %v438_v10, %v437_v9  ;;  %v1537_v9 = vld [vmem:[%s2013_s10 + $0x60] sm:$0xff]   ;;  %v1532_v10 = vld [vmem:[%s2013_s10 + $0x90] sm:$0xff]  }
 0x46d   :  { %v440_v15 = vrot.slane %v439_v14, 1 }
 0x46f   :  { %v441_v17 = vadd.f32 %v440_v15, %v439_v14  ;;  %v1535_v14 = vld [vmem:[%s2013_s10 + $0xd8] sm:$0xff]   ;;  %v1538_v15 = vld [vmem:[%s2013_s10 + $0x20] sm:$0xff]  }
 0x471   :  { %v442_v47 = vmul.f32 0.0625, %v441_v17  ;;  %v1541_v17 = vld [vmem:[%s2013_s10 + $0x68] sm:$0xff]  }
 0x473   :  { %v443_v18 = vsub.f32 %v431_v1, %v442_v47  ;;  %v444_v19 = vsub.f32 %v432_v2, %v442_v47  ;;  %v1527_v1 = vld [vmem:[%s2013_s10 + $0xc8] sm:$0xff]   ;;  %v1530_v2 = vld [vmem:[%s2013_s10 + $0x10] sm:$0xff]   ;;  %v1536_v47 = vld [vmem:[%s2013_s10 + $0x98] sm:$0xff]  }
 0x475   :  { %v445_v20 = vmul.f32 %v443_v18, %v443_v18  ;;  %v446_v49 = vmul.f32 %v444_v19, %v444_v19 }
 0x477   :  { %v447_v21 = vsel %vm412_vm2, %v445_v20, 0.0  ;;  %v448_v22 = vsel %vm412_vm2, %v446_v49, 0.0  ;;  %v1540_v20 = vld [vmem:[%s2013_s10 + $0xa0] sm:$0xff]   ;;  %v1543_v49 = vld [vmem:[%s2013_s10 + $0xe8] sm:$0xff]  }
 0x478   :  { %v449_v23 = vadd.f32 %v448_v22, %v447_v21  ;;  %v1544_v21 = vld [vmem:[%s2013_s10 + $0xa8] sm:$0xff]   ;;  %v1545_v22 = vld [vmem:[%s2013_s10 + $0x70] sm:$0xff]  }
 0x47a   :  { %v450_v24 = vrot.slane %v449_v23, 4 }
 0x47c   :  { %v451_v25 = vadd.f32 %v450_v24, %v449_v23  ;;  %v1546_v23 = vld [vmem:[%s2013_s10 + $0x30] sm:$0xff]  }
 0x47d   :  { %v1547_v24 = vld [vmem:[%s2013_s10 + $0xf0] sm:$0xff]  }
 0x47e   :  { %v452_v27 = vrot.slane %v451_v25, 2 }
 0x480   :  { %v453_v28 = vadd.f32 %v452_v27, %v451_v25  ;;  %v1548_v25 = vld [vmem:[%s2013_s10 + $0xb0] sm:$0xff]   ;;  %v1549_v27 = vld [vmem:[%s2013_s10 + $0x78] sm:$0xff]  }
 0x482   :  { %v454_v29 = vrot.slane %v453_v28, 1 }
 0x484   :  { %v455_v30 = vadd.f32 %v454_v29, %v453_v28  ;;  %v1550_v28 = vld [vmem:[%s2013_s10 + $0x38] sm:$0xff]  }
 0x485   :  { %v1551_v29 = vld [vmem:[%s2013_s10 + $0xf8] sm:$0xff]  }
 0x486   :  { %v456_v31 = vmul.f32 0.0625, %v455_v30  ;;  %v1552_v30 = vld [vmem:[%s2013_s10 + $0xb8] sm:$0xff]  }
 0x488   :  { %v457_v32 = vadd.f32 1e-05, %v456_v31  ;;  %v1553_v31 = vld [vmem:[%s2013_s10 + $0x140] sm:$0xff]  }
 0x48a   :  { %1569 = vrsqrt.f32 %v457_v32  ;;  %v532_v32 = vld [vmem:[%s2012_s9] sm:$0x3f] }
 0x494   :  { %v1570_v33 = vpop.eup %1569 }
 0x495   :  { %v459_v34 = vmul.f32 %v1570_v33, %v1728_v38  ;;  %v1506_v38 = vld [vmem:[%s2011_s8 + $0x8] ss:$24 sps:$4 sm:$0xff]   ;;  %v537_v33 = vrot.slane %v532_v32, %v1702_v13 }
 0x497   :  { %v463_v40 = vrot.slane %v459_v34, %v1705_v16  ;;  %v545_v34 = vrot.slane %v532_v32, %v1705_v16 }
 0x499   :  { %v464_v42 = vmul.f32 %v463_v40, %v443_v18  ;;  %v465_v43 = vmul.f32 %v463_v40, %v444_v19  ;;  %v1539_v18 = vld [vmem:[%s2013_s10 + $0xe0] sm:$0xff]   ;;  %v1542_v19 = vld [vmem:[%s2013_s10 + $0x28] sm:$0xff]   ;;  %v541_v40 = vrot.slane %v532_v32, %v1699_v12 }
 0x49b   :  { %v470_v5 = vadd.f32 %v469_v41, %v464_v42  ;;  %v471_v44 = vadd.f32 %v469_v41, %v465_v43  ;;  %v549_v41 = vrot.slane %v532_v32, %v1753_v26 }
 0x49d   :  { %v472_v45 = vmax.f32 %v470_v5, 0.0  ;;  %v473_v46 = vmax.f32 %v471_v44, 0.0 }
 0x49f   :  { %v475_v36 = vpack.c.bf16 %v473_v46, %v472_v45 }
 0x4a1   :  { %1482 = vmatpush3.bf16.msra.mxu1 %v475_v36 }
 0x4a2   :  { %668 = vmatprep.subr.bf16.mxu1 %v1508_v48 }
 0x4a4   :  { %1484 = vmatmul.mubr.msk.bf16.vlgmr.msra.gmra.mrb[0].mxu1 %vm147_vm1, %v474_v37 }
 0x4a5   :  { %669 = vmatpush1.bf16.msra.mxu1 %v1506_v38  ;;  %700 = vmatprep.mubr.bf16.mxu1 %v1600_v8 }
 0x4a6   :  { %670 = vmatprep.subr.bf16.mxu1 %v1514_v50  ;;  %v556_v50 = vsub.s32 5, %v1696_v11 }
 0x4a9   :  { %671 = vmatpush1.bf16.msra.mxu1 %v1512_v51 }
 0x4aa   :  { %1397 = vmatprep.subr.bf16.mxu1 %v1521_v39 }
 0x577   :  { %v513_v52 = vpop.f32.mrb[0].mxu1 }
 0x578   :  { %v519_v54 = vpack.c.bf16 %v513_v52, %v513_v52  ;;  %v1485_v55 = vpop.f32.mrb[1].mxu1 }
 0x579   :  { %v516_v58 = vpop.f32.mrb[2].mxu1 }
 0x57a   :  { %v1486_v60 = vpop.f32.mrb[3].mxu1  ;;  %1335 = vmatmul.mubr.msk.bf16.vlgmr.msra.gmra.mrb[12].mxu0 %vm412_vm2, %v519_v54  ;;  %1336 = vmatmul.mubr.msk.bf16.vlgmr.msra.gmra.mrb[4].mxu1 %vm412_vm2, %v519_v54 }
 0x57b   :  { %710 = vmatpush1.bf16.msra.mxu0 %v1515_v53  ;;  %741 = vmatprep.mubr.bf16.mxu0 %v1600_v8  ;;  %v1524_v8 = vld [vmem:[%s2013_s10 + $0x80] sm:$0xff]   ;;  %v557_v53 = vrot.slane %v532_v32, %v556_v50 }
 0x57c   :  { %711 = vmatprep.subr.bf16.mxu0 %v1520_v56  ;;  %1398 = vmatpush3.bf16.msra.mxu1 %v1522_v57  ;;  %v1555_v57 = vld [vmem:[%s2013_s10 + $0x148] sm:$0xff]  }
 0x57d   :  { %1399 = vmatprep.subr.bf16.mxu1 %v1525_v59 }
 0x57f   :  { %712 = vmatpush1.bf16.msra.mxu0 %v1518_v61 }
 0x580   :  { %1419 = vmatprep.subr.bf16.mxu0 %v1523_v62  ;;  %1400 = vmatpush3.bf16.msra.mxu1 %v1526_v63  ;;  %v1556_v62 = vld [vmem:[%s2013_s10 + $0x108] sm:$0xff]  }
 0x581   :  { %1401 = vmatprep.subr.bf16.mxu1 %v1529_v0  ;;  %v1557_v0 = vld [vmem:[%s2013_s10 + $0x150] sm:$0xff]  }
 0x582   :  { %1337 = vmatmul.mubr.msk.bf16.vlgmr.msra.gmra.mrb[16].mxu0 %vm412_vm2, %v519_v54  ;;  %v1554_v54 = vld [vmem:[%s2013_s10 + $0x100] sm:$0xff]  }
 0x583   :  { %1420 = vmatpush3.bf16.msra.mxu0 %v1524_v8 }
 0x584   :  { %1421 = vmatprep.subr.bf16.mxu0 %v1527_v1  ;;  %1402 = vmatpush3.bf16.msra.mxu1 %v1530_v2  ;;  %v1558_v2 = vld [vmem:[%s2013_s10 + $0x110] sm:$0xff]  }
 0x585   :  { %1403 = vmatprep.subr.bf16.mxu1 %v1533_v3  ;;  %v1559_v3 = vld [vmem:[%s2013_s10 + $0x158] sm:$0xff]  }
 0x587   :  { %1422 = vmatpush3.bf16.msra.mxu0 %v1528_v4  ;;  %v1560_v4 = vld [vmem:[%s2013_s10 + $0x118] sm:$0xff]  }
 0x588   :  { %1423 = vmatprep.subr.bf16.mxu0 %v1531_v6  ;;  %1404 = vmatpush3.bf16.msra.mxu1 %v1534_v7  ;;  %v1561_v6 = vld [vmem:[%s2013_s10 + $0x160] sm:$0xff]  }
 0x589   :  { %1405 = vmatprep.subr.bf16.mxu1 %v1537_v9  ;;  %v1562_v7 = vld [vmem:[%s2013_s10 + $0x120] sm:$0xff]   ;;  %v552_v9 = vsub.s32 4, %v1696_v11  ;;  %v1566_v11 = vld [vmem:[%s2013_s10 + $0x130] sm:$0xff]  }
 0x58b   :  { %1424 = vmatpush3.bf16.msra.mxu0 %v1532_v10  ;;  %v1563_v10 = vld [vmem:[%s2013_s10 + $0x168] sm:$0xff]  }
 0x58c   :  { %1425 = vmatprep.subr.bf16.mxu0 %v1535_v14  ;;  %1406 = vmatpush3.bf16.msra.mxu1 %v1538_v15  ;;  %v1564_v14 = vld [vmem:[%s2013_s10 + $0x128] sm:$0xff]   ;;  %v553_v15 = vrot.slane %v532_v32, %v552_v9 }
 0x58d   :  { %1407 = vmatprep.subr.bf16.mxu1 %v1541_v17  ;;  %v1565_v17 = vld [vmem:[%s2013_s10 + $0x170] sm:$0xff]  }
 0x58f   :  { %1426 = vmatpush3.bf16.msra.mxu0 %v1536_v47 }
 0x590   :  { %1427 = vmatprep.subr.bf16.mxu0 %v1539_v18  ;;  %1408 = vmatpush3.bf16.msra.mxu1 %v1542_v19  ;;  %v1567_v18 = vld [vmem:[%s2013_s10 + $0x178] sm:$0xff]  }
 0x591   :  { %1409 = vmatprep.subr.bf16.mxu1 %v1545_v22  ;;  %v1568_v19 = vld [vmem:[%s2013_s10 + $0x138] sm:$0xff]   ;;  %s1606_s10 = smov [#allocation5]  }
 0x592   :  { %s1281_s1 = sshll.u32 %s1606_s10, 4  ;;  %s1282_s1 = int_to_ptr.vmem [resolvable:$true] %s1281_s1 }
 0x593   :  { %1428 = vmatpush3.bf16.msra.mxu0 %v1540_v20  ;;  %p1576_p1 = scmp.lt.s32.totalorder %s1282_s1, %s1282_s1 }
 0x594   :  { %1429 = vmatprep.subr.bf16.mxu0 %v1543_v49  ;;  %1410 = vmatpush3.bf16.msra.mxu1 %v1546_v23  ;;  %v1338_v23 = vld [vmem:[%s2014_s11] ss:$0 sm:$0xff]  ;;  %s1571_s11 = scalar_lea.vmem %s1282_s1, 32 }
 0x595   :  { %1411 = vmatprep.subr.bf16.mxu1 %v1549_v27  ;;  %p1572_p0 = scmp.ne.s32.totalorder %s1282_s1, %s1571_s11  ;;  %p1577_p2 = scmp.lt.s32.totalorder %s1571_s11, %s1571_s11 }
 0x597   :  { %1430 = vmatpush3.bf16.msra.mxu0 %v1544_v21  ;;  %p1578_p3 = por %p1577_p2, %p1576_p1 }
 0x598   :  { %1431 = vmatprep.subr.bf16.mxu0 %v1547_v24  ;;  %1412 = vmatpush3.bf16.msra.mxu1 %v1550_v28 }
 0x599   :  { %1441 = vmatprep.subr.bf16.mxu1 %v1553_v31  ;;  %p1579_p4 = pnand %p1578_p3, %p1572_p0 }
 0x59b   :  { %1432 = vmatpush3.bf16.msra.mxu0 %v1548_v25 }
 0x59c   :  { %1433 = vmatprep.subr.bf16.mxu0 %v1551_v29 }
 0x59f   :  { %1434 = vmatpush3.bf16.msra.mxu0 %v1552_v30 }
 0x64d   :  { %v661_v42 = vpop.f32.mrb[12].mxu0  ;;  %v702_v43 = vpop.f32.mrb[4].mxu1 }
 0x64e   :  { %v662_v5 = vadd.f32 %v661_v42, %v537_v33  ;;  %v703_v44 = vadd.f32 %v702_v43, %v545_v34  ;;  %v663_v45 = vpop.f32.mrb[13].mxu0  ;;  %v704_v46 = vpop.f32.mrb[5].mxu1 }
 0x64f   :  { %v664_v48 = vadd.f32 %v663_v45, %v541_v40  ;;  %v705_v36 = vadd.f32 %v704_v46, %v549_v41  ;;  %v665_v37 = vpop.f32.mrb[14].mxu0  ;;  %v706_v38 = vpop.f32.mrb[6].mxu1 }
 0x650   :  { %v750_v51 = vmax.f32 %v662_v5, 0.0  ;;  %v752_v13 = vmax.f32 %v703_v44, 0.0  ;;  %v666_v35 = vpop.f32.mrb[15].mxu0  ;;  %v707_v16 = vpop.f32.mrb[7].mxu1 }
 0x651   :  { %v751_v39 = vmax.f32 %v664_v48, 0.0  ;;  %v753_v12 = vmax.f32 %v705_v36, 0.0 }
 0x652   :  { %v756_v55 = vpack.c.bf16 %v750_v51, %v750_v51  ;;  %v758_v56 = vpack.c.bf16 %v752_v13, %v752_v13 }
 0x653   :  { %v757_v52 = vpack.c.bf16 %v751_v39, %v751_v39  ;;  %v759_v26 = vpack.c.bf16 %v753_v12, %v753_v12 }
 0x655   :  { %v743_v58 = vpop.f32.mrb[16].mxu0  ;;  %1185 = vmatprep.mubr.bf16.mxu1 %v757_v52  ;;  %1225 = vmatprep.mubr.bf16.mxu0 %v759_v26 }
 0x656   :  { %v745_v59 = vpop.f32.mrb[17].mxu0  ;;  %1186 = vmatmul.mubr.bf16.vlgmr.msra.gmra.mrb[8].mxu1 %v756_v55  ;;  %1226 = vmatmul.mubr.bf16.vlgmr.msra.gmra.mrb[20].mxu0 %v758_v56  ;;  %v744_v47 = vadd.f32 %v743_v58, %v553_v15 }
 0x657   :  { %v746_v60 = vadd.f32 %v745_v59, %v557_v53  ;;  %1442 = vmatpush3.bf16.msra.mxu1 %v1554_v54  ;;  %v747_v61 = vpop.f32.mrb[18].mxu0 }
 0x658   :  { %v748_v63 = vpop.f32.mrb[19].mxu0  ;;  %1443 = vmatprep.subr.bf16.mxu1 %v1555_v57  ;;  %v754_v20 = vmax.f32 %v744_v47, 0.0 }
 0x659   :  { %v755_v8 = vmax.f32 %v746_v60, 0.0 }
 0x65a   :  { %v760_v49 = vpack.c.bf16 %v754_v20, %v754_v20 }
 0x65b   :  { %v761_v1 = vpack.c.bf16 %v755_v8, %v755_v8  ;;  %1444 = vmatpush3.bf16.msra.mxu1 %v1556_v62 }
 0x65c   :  { %1445 = vmatprep.subr.bf16.mxu1 %v1557_v0 }
 0x65d   :  { %1265 = vmatprep.mubr.bf16.mxu1 %v761_v1 }
 0x65f   :  { %1446 = vmatpush3.bf16.msra.mxu1 %v1558_v2 }
 0x660   :  { %1447 = vmatprep.subr.bf16.mxu1 %v1559_v3 }
 0x663   :  { %1448 = vmatpush3.bf16.msra.mxu1 %v1560_v4 }
 0x664   :  { %1449 = vmatprep.subr.bf16.mxu1 %v1561_v6 }
 0x667   :  { %1450 = vmatpush3.bf16.msra.mxu1 %v1562_v7 }
 0x668   :  { %1451 = vmatprep.subr.bf16.mxu1 %v1563_v10 }
 0x66b   :  { %1452 = vmatpush3.bf16.msra.mxu1 %v1564_v14 }
 0x66c   :  { %1453 = vmatprep.subr.bf16.mxu1 %v1565_v17 }
 0x66f   :  { %1454 = vmatpush3.bf16.msra.mxu1 %v1566_v11 }
 0x670   :  { %1455 = vmatprep.subr.bf16.mxu1 %v1567_v18 }
 0x673   :  { %1456 = vmatpush3.bf16.msra.mxu1 %v1568_v19 }
 0x676   :  { %1266 = vmatmul.mubr.bf16.vlgmr.msra.gmra.mrb[12].mxu1 %v760_v49 }
 0x729   :  { %v1413_v21 = vpop.f32.mrb[8].mxu1  ;;  %v1435_v22 = vpop.f32.mrb[20].mxu0 }
 0x72a   :  { %v1414_v24 = vpop.f32.mrb[9].mxu1  ;;  %v1436_v25 = vpop.f32.mrb[21].mxu0 }
 0x72b   :  { %v1415_v27 = vadd.f32 %v1414_v24, %v1413_v21  ;;  %v1437_v28 = vadd.f32 %v1436_v25, %v1435_v22  ;;  %v1416_v29 = vpop.f32.mrb[10].mxu1  ;;  %v1438_v30 = vpop.f32.mrb[22].mxu0 }
 0x72c   :  { %v1417_v31 = vpop.f32.mrb[11].mxu1  ;;  %v1439_v32 = vpop.f32.mrb[23].mxu0 }
 0x72d   :  { %v1188_v33 = vadd.f32 %v1415_v27, %v1338_v23 }
 0x72f   :  { %v1228_v34 = vadd.f32 %v1437_v28, %v1188_v33 }
 0x749   :  { %v1457_v40 = vpop.f32.mrb[12].mxu1 }
 0x74a   :  { %v1458_v41 = vpop.f32.mrb[13].mxu1 }
 0x74b   :  { %v1459_v42 = vadd.f32 %v1458_v41, %v1457_v40  ;;  %v1460_v43 = vpop.f32.mrb[14].mxu1 }
 0x74c   :  { %v1461_v5 = vpop.f32.mrb[15].mxu1 }
 0x74d   :  { %v1268_v44 = vadd.f32 %v1459_v42, %v1228_v34 }
 0x74f   :  { %1274 = vst.msk [vmem:[#allocation5] sm:$0x3] %vm1273_vm3, %v1268_v44 }
 0x750   :  { %1582 = shalt.err (!%p1579_p4)
}
 0x751   :  { %s1583_s5 = scalar_lea.hbm %s2015_s12, 32 }
 0x752   :  { %p1584_p5 = scmp.ne.s32.totalorder %s2015_s12, %s1583_s5  ;;  %p1587_p6 = scmp.lt.u32.totalorder %s1583_s5, %s2015_s12 }
 0x754   :  { %p1589_p7 = pnand %p1587_p6, %p1584_p5 }
 0x756   :  { %1592 = shalt.err (!%p1589_p7)
}
 0x757   :  { %1284 = dma.vmem_to_hbm [thread:$0]  %s1282_s1, 32, %s2015_s12, [#allocation6]  }
 0x758   :  { %1597 = dma.done.wait [#allocation6], 32  }
 0x759   :  { %1598 = vsyncadd [#allocation6], 4294967264 }
 0x75a   :  { %1288 = vsyncpa [#allocation6], 1 }
 0x75b   :  { %1289 = vsyncmov [#allocation3] }
 0x75e   :  { %s1290_s6 = vpop.sfrf %1289 }
 0x75f   :  { %p1387_p8 = scmp.ne.s32.totalorder %s1290_s6, 0 }
 0x761   :  { %1294 = shalt.err (%p1387_p8)  }
 0x762   :  { %1296 = vsyncmov [#allocation3 + $0x1] }
 0x765   :  { %s1297_s7 = vpop.sfrf %1296 }
 0x766   :  { %p1388_p9 = scmp.ne.s32.totalorder %s1297_s7, 0 }
 0x768   :  { %1301 = shalt.err (%p1388_p9)  }

</bundles_post_ra>
